<compile_context>
chip_gen: v7x
topology: tpu7x:2x2x1
jax: 0.10.0
libtpu: 0.0.40
codegen_flags: <defaults>
</compile_context>

<pallas_src>
import functools
import math

import jax
import jax.numpy as jnp
from jax.experimental import pallas as pl
from jax.experimental.pallas import tpu as pltpu


# --------------------------------------------------------------------------
# Small helpers
# --------------------------------------------------------------------------
def _round_up(x: int, m: int) -> int:
    return (x + m - 1) // m * m


def _cdiv(a: int, b: int) -> int:
    return (a + b - 1) // b


def _vmem_capacity_bytes() -> int:
    """Physical per-core VMEM; generation-aware fallback (v7x: 64 MiB, else 128 MiB)."""
    try:
        cap = int(pltpu.get_tpu_info().vmem_capacity_bytes)
        if cap >= (16 << 20):
            return cap
    except Exception:
        pass
    kind = ""
    try:
        kind = jax.devices()[0].device_kind.lower()
    except Exception:
        pass
    return (64 << 20) if "v7" in kind else (128 << 20)


# --------------------------------------------------------------------------
# Fast path: whole (d_model, vocab) weight resident in VMEM.
# --------------------------------------------------------------------------
def _proj_ls_resident_kernel(x_ref, w_ref, b_ref, o_ref):
    # x_ref: (tm, d_model); w_ref: (d_model, vocab) resident; b_ref: (1, vocab) f32.
    z = jnp.dot(x_ref[...], w_ref[...], preferred_element_type=jnp.float32)
    z = z + b_ref[...]
    m = jnp.max(z, axis=-1, keepdims=True)
    lse = m + jnp.log(jnp.sum(jnp.exp(z - m), axis=-1, keepdims=True))
    o_ref[...] = (z - lse).astype(o_ref.dtype)


# --------------------------------------------------------------------------
# Weight-stationary tiled path (default for rows < vocab).
# grid = (pass, vocab_tile, row_tile); rows innermost => the (d_model, tn)
# weight block index (0, j) is constant over the whole inner row loop, so the
# weight is DMA'd from HBM exactly once per (pass, vocab tile): 2x in total.
# --------------------------------------------------------------------------
def _proj_ls_ws_kernel(x_ref, w_ref, b_ref, o_ref, m_sc, l_sc,
                       *, tn, vocab, ragged_n, last_j):
    # m_sc / l_sc: (n_row_tiles, tm, 1) f32 running row max / sum-exp, one slot
    # per row tile (they persist across the outer vocab loop of pass 0).
    p = pl.program_id(0)
    j = pl.program_id(1)
    i = pl.program_id(2)

    @pl.when(jnp.logical_and(p == 0, j == 0))
    def _init():
        m_sc[i] = jnp.full(m_sc.shape[1:], -jnp.inf, jnp.float32)
        l_sc[i] = jnp.zeros(l_sc.shape[1:], jnp.float32)

    # (tm, tn) logit tile on the MXU, f32 accumulation (operands may be bf16).
    z = jnp.dot(x_ref[...], w_ref[...], preferred_element_type=jnp.float32)
    z = z + b_ref[...]

    @pl.when(p == 0)
    def _accumulate():
        # Pass 0 stores the raw logits so the output blocks (which the pipeline
        # flushes as their index advances) only ever hold defined data; pass 1
        # overwrites them with log-probs.  The output is therefore written twice
        # -- the (small) price for streaming the weight only twice in total and
        # needing no output-index tricks / megacore-unsafe pinning.
        o_ref[...] = z.astype(o_ref.dtype)

        def update(zt):
            m_prev = m_sc[i]
            m_new = jnp.maximum(m_prev, jnp.max(zt, axis=-1, keepdims=True))
            l_sc[i] = (l_sc[i] * jnp.exp(m_prev - m_new)
                       + jnp.sum(jnp.exp(zt - m_new), axis=-1, keepdims=True))
            m_sc[i] = m_new

        if ragged_n:
            # Only the last vocab tile has out-of-range lanes; keep the common
            # path free of per-step iota/compare/select VPU work.
            @pl.when(j == last_j)
            def _masked():
                col = jax.lax.broadcasted_iota(jnp.int32, z.shape, 1)
                update(jnp.where(col < (vocab - last_j * tn), z, -jnp.inf))

            @pl.when(j != last_j)
            def _unmasked():
                update(z)
        else:
            update(z)

    @pl.when(p == 1)
    def _write():
        # Out-of-range lanes / rows of ragged last tiles are dropped by the
        # masked output store, so z needs no masking here.  (Note: masked ragged
        # rows of x are undefined and may produce NaN/Inf in throwaway rows.)
        lse = m_sc[i] + jnp.log(l_sc[i])
        o_ref[...] = (z - lse).astype(o_ref.dtype)


# --------------------------------------------------------------------------
# Row-major fallback (very large `rows`): vocab innermost, weight re-streamed
# twice per row tile, bias fully VMEM resident (zero-padded to n_vocab_tiles*tn).
# --------------------------------------------------------------------------
def _proj_ls_rowmajor_kernel(x_ref, w_ref, b_ref, o_ref, m_sc, l_sc,
                             *, tn, vocab, ragged_n, last_j):
    p = pl.program_id(1)
    j = pl.program_id(2)

    @pl.when(jnp.logical_and(p == 0, j == 0))
    def _init():
        m_sc[...] = jnp.full(m_sc.shape, -jnp.inf, jnp.float32)
        l_sc[...] = jnp.zeros(l_sc.shape, jnp.float32)
        # Defensive only: the output block is pinned at (i, 0) for the whole of
        # pass 0 (see out_specs) and is not flushed until pass 1 has stored real
        # data; zero it so it never holds uninitialized memory regardless.
        o_ref[...] = jnp.zeros(o_ref.shape, o_ref.dtype)

    b_tile = b_ref[:, pl.ds(pl.multiple_of(j * tn, 128), tn)]
    z = jnp.dot(x_ref[...], w_ref[...], preferred_element_type=jnp.float32)
    z = z + b_tile

    @pl.when(p == 0)
    def _accumulate():
        def update(zt):
            m_prev = m_sc[...]
            m_new = jnp.maximum(m_prev, jnp.max(zt, axis=-1, keepdims=True))
            l_sc[...] = (l_sc[...] * jnp.exp(m_prev - m_new)
                         + jnp.sum(jnp.exp(zt - m_new), axis=-1, keepdims=True))
            m_sc[...] = m_new

        if ragged_n:
            @pl.when(j == last_j)
            def _masked():
                col = jax.lax.broadcasted_iota(jnp.int32, z.shape, 1)
                update(jnp.where(col < (vocab - last_j * tn), z, -jnp.inf))

            @pl.when(j != last_j)
            def _unmasked():
                update(z)
        else:
            update(z)

    @pl.when(p == 1)
    def _write():
        lse = m_sc[...] + jnp.log(l_sc[...])
        o_ref[...] = (z - lse).astype(o_ref.dtype)


# --------------------------------------------------------------------------
# Wrapper
# --------------------------------------------------------------------------
def proj_layer_forward(x, weight_t, bias, *, tm=None, tn=None, out_dtype=None,
                       compute_dtype=None, mode=None):
    """log_softmax(x @ weight_t + bias, axis=-1).

    x            : (..., d_model)   activations, channels last
    weight_t     : (d_model, vocab) pre-transposed Linear weight (bf16 recommended)
    bias         : (vocab,)         added / accumulated in f32
    tm, tn       : row / vocab tile overrides (None -> auto from the VMEM budget)
    out_dtype    : output dtype (None -> x.dtype; bf16 halves the HBM write)
    compute_dtype: MXU operand dtype (None -> weight_t.dtype)
    mode         : None (auto) | "resident" | "ws" | "rowmajor"
    """
    assert x.shape[-1] == weight_t.shape[0]
    d_model, vocab = weight_t.shape
    lead = x.shape[:-1]
    rows = math.prod(lead) if lead else 1
    if out_dtype is None:
        out_dtype = x.dtype
    if compute_dtype is None:
        compute_dtype = weight_t.dtype          # bf16 weights => bf16 MXU operands

    x2 = x.reshape(rows, d_model)
    if x2.dtype != jnp.dtype(compute_dtype):
        x2 = x2.astype(compute_dtype)
    w_c = weight_t
    if w_c.dtype != jnp.dtype(compute_dtype):
        w_c = w_c.astype(compute_dtype)
    bias2 = bias.reshape(1, vocab).astype(jnp.float32)   # hoisted cast, once

    xb = x2.dtype.itemsize
    wb = w_c.dtype.itemsize
    ob = jnp.dtype(out_dtype).itemsize

    # Sublane packing of the activation dtype: f32 -> 8 rows, bf16 -> 16, int8 -> 32.
    pack = 8 * max(1, 4 // max(1, xb))

    cap = _vmem_capacity_bytes()
    vmem_limit = int(cap * 0.75)
    budget = int(vmem_limit * 0.85)

    rows_pad = _round_up(rows, pack)
    vocab128 = _round_up(vocab, 128)

    # ---------------- resident fast path (whole weight in VMEM) ----------------
    # The weight is already resident, so a large row tile buys no reuse; keep tm
    # small (it only inflates the f32 logit temporaries and the output tile).
    tm_fast = min(tm if tm is not None else 128, rows_pad)
    tm_fast = _round_up(max(tm_fast, pack), pack)
    if rows > pack and _cdiv(rows, tm_fast) < 2:
        # v7x has 2 TensorCores: give the "parallel" rows axis at least 2 tiles.
        tm_fast = _round_up(_cdiv(rows, 2), pack)

    def _fast_bytes(tm_, single_consts):
        cbuf = 1 if single_consts else 2
        return (2 * tm_ * d_model * xb                 # x tile (double-buffered)
                + cbuf * d_model * vocab128 * wb       # resident weight
                + cbuf * 8 * vocab128 * 4              # resident bias (sublane-padded)
                + 2 * tm_ * vocab128 * ob              # output tile (double-buffered)
                + 3 * tm_ * vocab128 * 4)              # f32 logits / exp temporaries

    use_fast = (mode == "resident") or (
        mode is None and tn is None and _fast_bytes(tm_fast, True) <= budget)

    if use_fast:
        grid = (_cdiv(rows, tm_fast),)
        ce = pl.CostEstimate(
            flops=2 * rows * d_model * vocab,
            transcendentals=rows * vocab,
            bytes_accessed=(rows * d_model * xb + d_model * vocab * wb
                            + vocab * 4 + rows * vocab * ob))

        def _call(single_consts):
            if single_consts:
                # Constant-index operands: double-buffering them is pure VMEM waste.
                w_spec = pl.BlockSpec((d_model, vocab), lambda i: (0, 0),
                                      pipeline_mode=pl.Buffered(1))
                b_spec = pl.BlockSpec((1, vocab), lambda i: (0, 0),
                                      pipeline_mode=pl.Buffered(1))
            else:
                w_spec = pl.BlockSpec((d_model, vocab), lambda i: (0, 0))
                b_spec = pl.BlockSpec((1, vocab), lambda i: (0, 0))
            out = pl.pallas_call(
                _proj_ls_resident_kernel,
                out_shape=jax.ShapeDtypeStruct((rows, vocab), out_dtype),
                grid_spec=pltpu.PrefetchScalarGridSpec(
                    num_scalar_prefetch=0,
                    grid=grid,
                    in_specs=[
                        pl.BlockSpec((tm_fast, d_model), lambda i: (i, 0)),
                        w_spec,
                        b_spec,
                    ],
                    out_specs=pl.BlockSpec((tm_fast, vocab), lambda i: (i, 0)),
                ),
                compiler_params=pltpu.CompilerParams(
                    dimension_semantics=("parallel",),
                    vmem_limit_bytes=vmem_limit),
                cost_estimate=ce,
            )(x2, w_c, bias2)
            return jax.block_until_ready(out)     # no-op under jit tracing

        try:
            out = _call(True)
        except Exception:
            # pl.Buffered(1) / pipeline_mode not supported on this JAX version.
            out = _call(False)
        return out.reshape(*lead, vocab)

    # ---------------- tiled paths (vocab streamed in (d_model, tn) blocks) ------
    tm_t = min(tm if tm is not None else 512, rows_pad)
    tm_t = _round_up(max(tm_t, pack), pack)
    if rows > pack and _cdiv(rows, tm_t) < 2:
        tm_t = _round_up(_cdiv(rows, 2), pack)

    def _tile_bytes(tm_, tn_, ws):
        nrt_ = _cdiv(rows, tm_)
        b = (2 * tm_ * d_model * xb        # x tile (double-buffered)
             + 2 * d_model * tn_ * wb      # weight tile (double-buffered)
             + 2 * tm_ * tn_ * ob          # output tile (double-buffered)
             + 2 * tm_ * tn_ * 4)          # f32 logits + exp temporaries
        if ws:
            b += 2 * 8 * tn_ * 4                # streamed (1, tn) bias blocks
            b += 2 * nrt_ * tm_ * 128 * 4       # per-row-tile (m, l) running stats
        else:
            b += 8 * _round_up(vocab, tn_) * 4  # fully resident padded bias
            b += 2 * tm_ * 128 * 4              # (m, l) scratch
        return b

    # Weight-stationary unless the per-row-tile running stats would eat too much
    # VMEM (very large `rows`), in which case fall back to the row-major order.
    if mode == "ws":
        use_ws = True
    elif mode == "rowmajor":
        use_ws = False
    else:
        use_ws = (2 * _cdiv(rows, tm_t) * tm_t * 128 * 4) <= budget // 4

    # Only shrink tm if even the smallest vocab tile would not fit (huge d_model);
    # otherwise keep tm large and pick tn below (never shrink tm to grow tn).
    while tm_t > pack and _tile_bytes(tm_t, 128, use_ws) > budget:
        tm_t = _round_up(max(pack, tm_t // 2), pack)

    n_row_tiles = _cdiv(rows, tm_t)

    if tn is not None:
        tn_t = min(_round_up(tn, 128), vocab128)
    else:
        tn_t = 128
        # Largest vocab tile that fits (>= 256 already fills the MXU N dim; going
        # bigger mainly cuts grid-step overhead and, on the weight-stationary
        # path, the number of x re-streams).
        for cand in (8192, 4096, 2048, 1024, 512, 256, 128):
            c = min(cand, vocab128)
            if _tile_bytes(tm_t, c, use_ws) <= budget:
                tn_t = c
                break

    n_vocab_tiles = _cdiv(vocab, tn_t)
    ragged_n = (vocab % tn_t) != 0
    last_j = n_vocab_tiles - 1

    if use_ws:
        kernel = functools.partial(_proj_ls_ws_kernel, tn=tn_t, vocab=vocab,
                                   ragged_n=ragged_n, last_j=last_j)
        ce = pl.CostEstimate(
            flops=2 * 2 * rows * d_model * vocab,        # pass 1 recomputes the matmul
            transcendentals=rows * vocab,                # exp only in pass 0
            bytes_accessed=(
                2 * n_vocab_tiles * rows * d_model * xb  # x re-streamed per (pass, vocab tile)
                + 2 * d_model * vocab * wb               # weight streamed once per pass
                + 2 * n_vocab_tiles * 8 * tn_t * 4       # bias tiles
                + 2 * rows * vocab * ob))                # logits (pass 0) + log-probs (pass 1)
        out = pl.pallas_call(
            kernel,
            out_shape=jax.ShapeDtypeStruct((rows, vocab), out_dtype),
            grid_spec=pltpu.PrefetchScalarGridSpec(
                num_scalar_prefetch=0,
                grid=(2, n_vocab_tiles, n_row_tiles),    # rows innermost
                in_specs=[
                    pl.BlockSpec((tm_t, d_model), lambda p, j, i: (i, 0)),
                    pl.BlockSpec((d_model, tn_t), lambda p, j, i: (0, j)),  # const over i
                    pl.BlockSpec((1, tn_t), lambda p, j, i: (0, j)),        # const over i
                ],
                out_specs=pl.BlockSpec((tm_t, tn_t), lambda p, j, i: (i, j)),
                scratch_shapes=[
                    pltpu.VMEM((n_row_tiles, tm_t, 1), jnp.float32),  # running row max
                    pltpu.VMEM((n_row_tiles, tm_t, 1), jnp.float32),  # running row sum-exp
                ],
            ),
            # The pass and vocab axes carry the softmax reduction and the row axis
            # must stay innermost for weight-stationarity, so all three are
            # "arbitrary".  (A small leading "parallel" row-group axis could shard
            # this schedule across v7x's two TensorCores; left as future work.)
            compiler_params=pltpu.CompilerParams(
                dimension_semantics=("arbitrary", "arbitrary", "arbitrary"),
                vmem_limit_bytes=vmem_limit),
            cost_estimate=ce,
        )(x2, w_c, bias2)
        return out.reshape(*lead, vocab)

    # ---------------- row-major fallback (very large `rows`) --------------------
    vocab_pad = n_vocab_tiles * tn_t
    bias_pad = bias2 if vocab_pad == vocab else jnp.pad(
        bias2, ((0, 0), (0, vocab_pad - vocab)))
    kernel = functools.partial(_proj_ls_rowmajor_kernel, tn=tn_t, vocab=vocab,
                               ragged_n=ragged_n, last_j=last_j)
    ce = pl.CostEstimate(
        flops=2 * 2 * rows * d_model * vocab,
        transcendentals=rows * vocab,
        bytes_accessed=(
            rows * d_model * xb
            + 2 * n_row_tiles * d_model * vocab * wb     # weight re-streamed per row tile
            + 8 * vocab_pad * 4
            + rows * vocab * ob))
    out = pl.pallas_call(
        kernel,
        out_shape=jax.ShapeDtypeStruct((rows, vocab), out_dtype),
        grid_spec=pltpu.PrefetchScalarGridSpec(
            num_scalar_prefetch=0,
            grid=(n_row_tiles, 2, n_vocab_tiles),        # vocab innermost
            in_specs=[
                pl.BlockSpec((tm_t, d_model), lambda i, p, j: (i, 0)),
                pl.BlockSpec((d_model, tn_t), lambda i, p, j: (0, j)),
                pl.BlockSpec((1, vocab_pad), lambda i, p, j: (0, 0)),   # resident bias
            ],
            # During pass 0 every step maps the output to block (i, 0): the block
            # stays resident (documented accumulator semantics: blocks are only
            # written back when their index changes) and is first flushed once
            # pass 1 has stored real data.  The kernel also zero-initialises it
            # defensively at the start of each row tile.
            out_specs=pl.BlockSpec((tm_t, tn_t), lambda i, p, j: (i, j * p)),
            scratch_shapes=[
                pltpu.VMEM((tm_t, 1), jnp.float32),
                pltpu.VMEM((tm_t, 1), jnp.float32),
            ],
        ),
        compiler_params=pltpu.CompilerParams(
            dimension_semantics=("parallel", "arbitrary", "arbitrary"),
            vmem_limit_bytes=vmem_limit),
        cost_estimate=ce,
    )(x2, w_c, bias_pad)
    return out.reshape(*lead, vocab)


def init_proj_layer_params(key, d_model, vocab_size, dtype=jnp.bfloat16):
    """torch.nn.Linear-style init; weight returned pre-transposed as (d_model, vocab).

    bf16 is the recommended storage / matmul dtype for the weight on TPU (2x MXU
    rate on v6e/v7x and half the HBM weight stream); the bias is kept in f32 and
    added to the f32 accumulator.
    """
    kw, kb = jax.random.split(key)
    bound = 1.0 / math.sqrt(d_model)
    weight = jax.random.uniform(kw, (vocab_size, d_model), jnp.float32, -bound, bound)
    bias = jax.random.uniform(kb, (vocab_size,), jnp.float32, -bound, bound)
    return weight.T.astype(dtype), bias


if __name__ == "__main__":
    key = jax.random.PRNGKey(0)
    k1, k2, k3, k4, k5, k6 = jax.random.split(key, 6)

    # --- config 1: small vocab -> resident fast path, f32 weights (exact check) ---
    batch, seq, d_model, vocab = 2, 8, 32, 128
    x = jax.random.normal(k1, (batch, seq, d_model), jnp.float32)
    w_t, b = init_proj_layer_params(k2, d_model, vocab, dtype=jnp.float32)
    out = jax.block_until_ready(proj_layer_forward(x, w_t, b))
    ref = jax.nn.log_softmax(x @ w_t + b, axis=-1)
    assert out.shape == (batch, seq, vocab)
    assert jnp.allclose(out, ref, atol=1e-5, rtol=1e-5), "resident path mismatch"

    # --- config 2: weight-stationary tiled path, ragged rows & vocab, f32 ---
    batch2, seq2, d_model2, vocab2 = 2, 9, 64, 320        # rows=18, vocab % 128 != 0
    x2 = jax.random.normal(k3, (batch2, seq2, d_model2), jnp.float32)
    w2, b2 = init_proj_layer_params(k4, d_model2, vocab2, dtype=jnp.float32)
    out2 = jax.block_until_ready(
        proj_layer_forward(x2, w2, b2, tm=16, tn=128, mode="ws"))
    ref2 = jax.nn.log_softmax(x2 @ w2 + b2, axis=-1)
    assert out2.shape == (batch2, seq2, vocab2)
    assert jnp.allclose(out2, ref2, atol=1e-5, rtol=1e-5), "weight-stationary mismatch"

    # --- config 3: row-major fallback path, bf16 operands + f32 accumulation ---
    xb16 = x2.astype(jnp.bfloat16)
    w2b, b2b = init_proj_layer_params(k4, d_model2, vocab2)   # default dtype = bf16
    out3 = jax.block_until_ready(
        proj_layer_forward(xb16, w2b, b2b, tm=16, tn=128, mode="rowmajor",
                           out_dtype=jnp.float32))
    ref3 = jax.nn.log_softmax(
        xb16.astype(jnp.float32) @ w2b.astype(jnp.float32) + b2b, axis=-1)
    assert jnp.allclose(out3, ref3, atol=2e-2, rtol=2e-2), "row-major path mismatch"

    # --- config 4: auto path with bf16 activations + bf16 weights (recommended) ---
    batch4, seq4, d_model4, vocab4 = 4, 16, 128, 512
    x4 = jax.random.normal(k5, (batch4, seq4, d_model4), jnp.bfloat16)
    w4, b4 = init_proj_layer_params(k6, d_model4, vocab4)     # bf16 weights
    out4 = jax.block_until_ready(proj_layer_forward(x4, w4, b4))
    ref4 = jax.nn.log_softmax(
        x4.astype(jnp.float32) @ w4.astype(jnp.float32) + b4, axis=-1)
    assert out4.shape == (batch4, seq4, vocab4)
    assert jnp.allclose(out4.astype(jnp.float32), ref4, atol=2e-2, rtol=2e-2)

    print("KERNEL_OK")
</pallas_src>

<mosaic_0001>
module attributes {stable_mosaic.version = 11 : i64} {
  func.func @_proj_ls_resident_kernel(%arg0: i32, %arg1: memref<8x32xf32, #tpu.memory_space<vmem>>, %arg2: memref<32x128xf32, #tpu.memory_space<vmem>>, %arg3: memref<1x128xf32, #tpu.memory_space<vmem>>, %arg4: memref<8x128xf32, #tpu.memory_space<vmem>>) attributes {dimension_semantics = [#tpu.dimension_semantics<parallel>], iteration_bounds = array<i64: 2>, scalar_prefetch = 0 : i64, scratch_operands = 0 : i64, tpu.core_type = #tpu.core_type<tc>, window_params = [{transform_indices = @transform_0, window_bounds = array<i64: 8, 32>}, {pipeline_mode = #tpu.pipeline_mode<synchronous>, transform_indices = @transform_1, window_bounds = array<i64: 32, 128>}, {pipeline_mode = #tpu.pipeline_mode<synchronous>, transform_indices = @transform_2, window_bounds = array<i64: 1, 128>}, {transform_indices = @transform_3, window_bounds = array<i64: 8, 128>}]} {
    %c0 = arith.constant 0 : index
    %c0_0 = arith.constant 0 : index
    %0 = vector.load %arg1[%c0, %c0_0] : memref<8x32xf32, #tpu.memory_space<vmem>>, vector<8x32xf32>
    %c0_1 = arith.constant 0 : index
    %c0_2 = arith.constant 0 : index
    %1 = vector.load %arg2[%c0_1, %c0_2] : memref<32x128xf32, #tpu.memory_space<vmem>>, vector<32x128xf32>
    %cst = arith.constant dense<0.000000e+00> : vector<8x128xf32>
    %2 = tpu.matmul %0, %1, %cst {dimension_numbers = #tpu.dot_dimension_numbers<[1], [0], [0], [1], [0, 0, 1, 1], [], []>} : vector<8x32xf32>, vector<32x128xf32>, vector<8x128xf32> -> vector<8x128xf32>
    %c0_3 = arith.constant 0 : index
    %c0_4 = arith.constant 0 : index
    %3 = vector.load %arg3[%c0_3, %c0_4] : memref<1x128xf32, #tpu.memory_space<vmem>>, vector<1x128xf32>
    %4 = vector.broadcast %3 : vector<1x128xf32> to vector<8x128xf32>
    %5 = arith.addf %2, %4 : vector<8x128xf32>
    %cst_5 = arith.constant dense<0xFF800000> : vector<8xf32>
    %6 = vector.multi_reduction <maximumf>, %5, %cst_5 [1] : vector<8x128xf32> to vector<8xf32>
    %7 = vector.shape_cast %6 : vector<8xf32> to vector<8x1xf32>
    %8 = vector.broadcast %7 : vector<8x1xf32> to vector<8x128xf32>
    %9 = arith.subf %5, %8 : vector<8x128xf32>
    %10 = math.exp %9 : vector<8x128xf32>
    %cst_6 = arith.constant dense<0.000000e+00> : vector<8xf32>
    %11 = vector.multi_reduction <add>, %10, %cst_6 [1] : vector<8x128xf32> to vector<8xf32>
    %12 = vector.shape_cast %11 : vector<8xf32> to vector<8x1xf32>
    %13 = math.log %12 : vector<8x1xf32>
    %14 = arith.addf %7, %13 : vector<8x1xf32>
    %15 = vector.broadcast %14 : vector<8x1xf32> to vector<8x128xf32>
    %16 = arith.subf %5, %15 : vector<8x128xf32>
    %c0_7 = arith.constant 0 : index
    %c0_8 = arith.constant 0 : index
    %17 = vector.load %arg4[%c0_7, %c0_8] : memref<8x128xf32, #tpu.memory_space<vmem>>, vector<8x128xf32>
    tpu.vector_store %arg4[%c0_7, %c0_8], %16 {strides = array<i32>} : memref<8x128xf32, #tpu.memory_space<vmem>>, vector<8x128xf32>,
    return
  }
  func.func @transform_0(%arg0: i32) -> (i32, i32) {
    %c0_i32 = arith.constant 0 : i32
    %c0_i32_0 = arith.constant 0 : i32
    return %arg0, %c0_i32 : i32, i32
  }
  func.func @transform_1(%arg0: i32) -> (i32, i32) {
    %c0_i32 = arith.constant 0 : i32
    %c0_i32_0 = arith.constant 0 : i32
    %c0_i32_1 = arith.constant 0 : i32
    return %c0_i32, %c0_i32_0 : i32, i32
  }
  func.func @transform_2(%arg0: i32) -> (i32, i32) {
    %c0_i32 = arith.constant 0 : i32
    %c0_i32_0 = arith.constant 0 : i32
    %c0_i32_1 = arith.constant 0 : i32
    return %c0_i32, %c0_i32_0 : i32, i32
  }
  func.func @transform_3(%arg0: i32) -> (i32, i32) {
    %c0_i32 = arith.constant 0 : i32
    %c0_i32_0 = arith.constant 0 : i32
    return %arg0, %c0_i32 : i32, i32
  }
}

module attributes {stable_mosaic.version = 11 : i64} {
  func.func @_proj_ls_resident_kernel(%arg0: i32, %arg1: memref<8x32xf32, #tpu.memory_space<vmem>>, %arg2: memref<32x128xf32, #tpu.memory_space<vmem>>, %arg3: memref<1x128xf32, #tpu.memory_space<vmem>>, %arg4: memref<8x128xf32, #tpu.memory_space<vmem>>) attributes {dimension_semantics = [#tpu.dimension_semantics<parallel>], iteration_bounds = array<i64: 2>, scalar_prefetch = 0 : i64, scratch_operands = 0 : i64, tpu.core_type = #tpu.core_type<tc>, window_params = [{transform_indices = @transform_0, window_bounds = array<i64: 8, 32>}, {pipeline_mode = #tpu.pipeline_mode<synchronous>, transform_indices = @transform_1, window_bounds = array<i64: 32, 128>}, {pipeline_mode = #tpu.pipeline_mode<synchronous>, transform_indices = @transform_2, window_bounds = array<i64: 1, 128>}, {transform_indices = @transform_3, window_bounds = array<i64: 8, 128>}]} {
    %c0 = arith.constant 0 : index
    %c0_0 = arith.constant 0 : index
    %0 = vector.load %arg1[%c0, %c0_0] : memref<8x32xf32, #tpu.memory_space<vmem>>, vector<8x32xf32>
    %c0_1 = arith.constant 0 : index
    %c0_2 = arith.constant 0 : index
    %1 = vector.load %arg2[%c0_1, %c0_2] : memref<32x128xf32, #tpu.memory_space<vmem>>, vector<32x128xf32>
    %cst = arith.constant dense<0.000000e+00> : vector<8x128xf32>
    %2 = tpu.matmul %0, %1, %cst {dimension_numbers = #tpu.dot_dimension_numbers<[1], [0], [0], [1], [0, 0, 1, 1], [], []>} : vector<8x32xf32>, vector<32x128xf32>, vector<8x128xf32> -> vector<8x128xf32>
    %c0_3 = arith.constant 0 : index
    %c0_4 = arith.constant 0 : index
    %3 = vector.load %arg3[%c0_3, %c0_4] : memref<1x128xf32, #tpu.memory_space<vmem>>, vector<1x128xf32>
    %4 = vector.broadcast %3 : vector<1x128xf32> to vector<8x128xf32>
    %5 = arith.addf %2, %4 : vector<8x128xf32>
    %cst_5 = arith.constant dense<0xFF800000> : vector<8xf32>
    %6 = vector.multi_reduction <maximumf>, %5, %cst_5 [1] : vector<8x128xf32> to vector<8xf32>
    %7 = vector.shape_cast %6 : vector<8xf32> to vector<8x1xf32>
    %8 = vector.broadcast %7 : vector<8x1xf32> to vector<8x128xf32>
    %9 = arith.subf %5, %8 : vector<8x128xf32>
    %10 = math.exp %9 : vector<8x128xf32>
    %cst_6 = arith.constant dense<0.000000e+00> : vector<8xf32>
    %11 = vector.multi_reduction <add>, %10, %cst_6 [1] : vector<8x128xf32> to vector<8xf32>
    %12 = vector.shape_cast %11 : vector<8xf32> to vector<8x1xf32>
    %13 = math.log %12 : vector<8x1xf32>
    %14 = arith.addf %7, %13 : vector<8x1xf32>
    %15 = vector.broadcast %14 : vector<8x1xf32> to vector<8x128xf32>
    %16 = arith.subf %5, %15 : vector<8x128xf32>
    %c0_7 = arith.constant 0 : index
    %c0_8 = arith.constant 0 : index
    %17 = vector.load %arg4[%c0_7, %c0_8] : memref<8x128xf32, #tpu.memory_space<vmem>>, vector<8x128xf32>
    tpu.vector_store %arg4[%c0_7, %c0_8], %16 {strides = array<i32>} : memref<8x128xf32, #tpu.memory_space<vmem>>, vector<8x128xf32>,
    return
  }
  func.func @transform_0(%arg0: i32) -> (i32, i32) {
    %c0_i32 = arith.constant 0 : i32
    %c0_i32_0 = arith.constant 0 : i32
    return %arg0, %c0_i32 : i32, i32
  }
  func.func @transform_1(%arg0: i32) -> (i32, i32) {
    %c0_i32 = arith.constant 0 : i32
    %c0_i32_0 = arith.constant 0 : i32
    %c0_i32_1 = arith.constant 0 : i32
    return %c0_i32, %c0_i32_0 : i32, i32
  }
  func.func @transform_2(%arg0: i32) -> (i32, i32) {
    %c0_i32 = arith.constant 0 : i32
    %c0_i32_0 = arith.constant 0 : i32
    %c0_i32_1 = arith.constant 0 : i32
    return %c0_i32, %c0_i32_0 : i32, i32
  }
  func.func @transform_3(%arg0: i32) -> (i32, i32) {
    %c0_i32 = arith.constant 0 : i32
    %c0_i32_0 = arith.constant 0 : i32
    return %arg0, %c0_i32 : i32, i32
  }
}

</mosaic_0001>

<bundles_post_ra>
// kernel: tpu_custom_call.1
= control target key start
LH: loop header
LB: loop body
LE: loop exit
PB: predicated region body
PF: predicated region fallthrough
CT: control target
= control target key end

     0   :  { %8 = vsyncpa [#allocation3], 0  ;;  %s951_s0 = inlined_call_operand.hbm [shape: f32[16,32], index: 0, kind: input, shape index: {}]   ;;  %s952_s1 = inlined_call_operand.hbm [shape: f32[32,128], index: 1, kind: input, shape index: {}]   ;;  %s953_s2 = inlined_call_operand.hbm [shape: f32[1,128], index: 2, kind: input, shape index: {}]   ;;  %s954_s3 = inlined_call_operand.hbm [shape: f32[16,128], index: 3, kind: output, shape index: {}]  }
   0x1   :  { %10 = vsyncpa [#allocation3 + $0x1], 0 }
   0x2   :  { %11 = vsyncpa [#allocation6], 0 }
   0x3   :  { %12 = vsyncpa [#allocation4], 0 }
   0x4   :  { %14 = vsyncpa [#allocation4 + $0x1], 0  ;;  %s717_s12 = smov 0   ;;  %s719_s13 = smov 0  }
   0x5   :  { %s721_s14 = smov 0   ;;  %s723_s15 = smov 0  }
   0x6 LB: > { %s738_s16 = sadd.s32 4294967295, %s686_s15   ;;  %s414_s17 = sadd.s32 4294967294, %s686_s15   ;;  %s686_s15 = sphi %s723_s15, %s974_s15   ;;  %s682_s14 = sphi %s721_s14, %s973_s14   ;;  %s678_s13 = sphi %s719_s13, %s972_s13   ;;  %s674_s12 = sphi %s717_s12, %s971_s12  }
   0x7   : > { %p40_p0 = scmp.ne.s32.totalorder %s678_s13, %s674_s12  ;;  %p955_p1 = scmp.eq.s32.totalorder %s738_s16, 0 }
   0x8   : > { %p112_p3 = scmp.eq.s32.totalorder %s414_s17, 1  ;;  %p415_p5 = scmp.ge.s32.totalorder %s686_s15, 1 }
   0x9   : > { %p747_p4 = por %p955_p1, %p40_p0  ;;  %p119_p7 = scmp.lt.s32.totalorder %s686_s15, 3 }
   0xa   : > { %p752_p6 = por %p112_p3, %p40_p0  ;;  %s688_s21 = smov [#allocation5]  }
   0xb   : > { %s958_s18 = scalar_select %p747_p4, 1, 0 }
   0xc   : > { %s959_s19 = scalar_select %p752_p6, 1, 0 }
   0xd   : > { %p757_p8 = pnand %p415_p5, %p119_p7  ;;  %s131_s22 = sshll.u32 %s688_s21, 4  ;;  %s761_s22 = int_to_ptr.vmem [resolvable:$true] %s131_s22 }
   0xe   : > { %s689_s24 = smov [#allocation7]   ;;  %s530_s28 = scalar_lea.hbm %s952_s1, 512 }
   0xf   : > { %p466_p9 = pneg %p757_p8  ;;  %s145_s25 = sshll.u32 %s689_s24, 4  ;;  %s772_s25 = int_to_ptr.vmem [resolvable:$true] %s145_s25 }
  0x10   : > { %p531_p12 = scmp.ne.s32.totalorder %s952_s1, %s530_s28  ;;  %p537_p5 = scmp.lt.u32.totalorder %s530_s28, %s952_s1 }
  0x11   : > { %p768_p11 = pnand %p466_p9, %p955_p1 }
  0x13   : > { %p532_p13 = pneg %p768_p11 }
  0x15   : > { %p533_p0 = pnand %p532_p13, %p531_p12 }
  0x17   : > { %p534_p3 = pneg %p533_p0 }
  0x19   : > { %p539_p7 = pnand %p537_p5, %p534_p3 }
  0x1b   : > { %542 = shalt.err (!%p539_p7)
}
  0x1c   : > { %s543_s6 = scalar_lea.vmem %s761_s22, 512  ;;  %p551_p2 = scmp.lt.s32.totalorder %s761_s22, %s761_s22 }
  0x1d   : > { %p544_p9 = scmp.ne.s32.totalorder %s761_s22, %s543_s6  ;;  %p552_p12 = scmp.lt.s32.totalorder %s543_s6, %s543_s6 }
  0x1f   : > { %p546_p10 = pnand %p544_p9, %p532_p13  ;;  %p553_p0 = por %p552_p12, %p551_p2 }
  0x21   : > { %p547_p1 = pneg %p546_p10 }
  0x23   : > { %p554_p6 = pnand %p553_p0, %p547_p1 }
  0x25   : > { %557 = shalt.err (!%p554_p6)
}
  0x26   : > { %s690_s7 = smov 128   ;;  %s691_s8 = smov 8  }
  0x27   : > { %469 = dma.hbm_to_vmem [thread:$0]  (!%p768_p11), %s952_s1, 512, %s761_s22, [#allocation6], %s690_s7, %s690_s7, %s691_s8  }
  0x28   : > { %s558_s21 = scalar_lea.hbm %s953_s2, 16 }
  0x29   : > { %p559_p2 = scmp.ne.s32.totalorder %s953_s2, %s558_s21  ;;  %p565_p10 = scmp.lt.u32.totalorder %s558_s21, %s953_s2 }
  0x2b   : > { %p561_p1 = pnand %p559_p2, %p532_p13 }
  0x2d   : > { %p562_p6 = pneg %p561_p1 }
  0x2f   : > { %p567_p3 = pnand %p565_p10, %p562_p6 }
  0x31   : > { %570 = shalt.err (!%p567_p3)
}
  0x32   : > { %s571_s22 = scalar_lea.vmem %s772_s25, 16  ;;  %s578_s29 = scalar_lea.vmem %s772_s25, 32 }
  0x33   : > { %p572_p5 = scmp.ne.s32.totalorder %s772_s25, %s571_s22  ;;  %p579_p12 = scmp.lt.s32.totalorder %s772_s25, %s772_s25 }
  0x34   : > { %p580_p0 = scmp.lt.s32.totalorder %s578_s29, %s571_s22 }
  0x35   : > { %p574_p7 = pnand %p572_p5, %p532_p13 }
  0x36   : > { %p581_p2 = por %p580_p0, %p579_p12 }
  0x37   : > { %p575_p9 = pneg %p574_p7 }
  0x39   : > { %p582_p1 = pnand %p581_p2, %p575_p9 }
  0x3b   : > { %585 = shalt.err (!%p582_p1)
}
  0x3c   : > { %472 = dma.hbm_to_vmem [thread:$0]  (!%p768_p11), %s953_s2, 16, %s772_s25, [#allocation6]  }
  0x3d   : > { %s828_s5 = sadd.s32 1, %s686_s15   ;;  %s27_s23 = sadd.s32 1, %s682_s14 }
  0x3e   : > { %s24_s6 = ssub.s32 %s686_s15, %s828_s5  ;;  %p34_p13 = scmp.ne.s32.totalorder %s682_s14, %s678_s13 }
  0x3f   : > { %p25_p6 = scmp.eq.s32.totalorder %s24_s6, 0  ;;  %p35_p10 = scmp.eq.s32.totalorder %s686_s15, 0 }
  0x40   : > { %p962_p3 = scmp.eq.s32.totalorder %s738_s16, 1  ;;  %p483_p7 = scmp.lt.s32.totalorder %s686_s15, 2 }
  0x41   : > { %s844_s8 = scalar_select %p25_p6, %s682_s14, %s27_s23  }
  0x42   : > { %p838_p5 = por %p962_p3, %p34_p13  ;;  %p36_p9 = por %p35_p10, %p34_p13 }
  0x43   : > { %s156_s9 = sand.u32 1, %s682_s14   ;;  %s420_s25 = sshll.u32 %s686_s15, 7 }
  0x44   : > { %s963_s7 = scalar_select %p838_p5, 1, 0 }
  0x45   : > { %s419_s10 = sshll.u32 %s156_s9, 3  ;;  %s851_s21 = scalar_lea.hbm %s951_s0, %s420_s25 }
  0x46   : > { %s160_s24 = scalar_lea.vmem [#allocation2], %s419_s10  ;;  %p855_p11 = pnand %p483_p7, %p36_p9 }
  0x47   : > { %s167_s26 = sshll.u32 %s160_s24, 4  ;;  %s157_s28 = scalar_lea.sflag [#allocation3], %s156_s9  ;;  %s853_s26 = int_to_ptr.vmem [resolvable:$true] %s167_s26 }
  0x48   : > { %s586_s22 = scalar_lea.hbm %s851_s21, 128  ;;  %p588_p0 = pneg %p855_p11 }
  0x49   : > { %p587_p12 = scmp.ne.s32.totalorder %s851_s21, %s586_s22  ;;  %s591_s4 = scalar_lea.hbm %s951_s0, 256 }
  0x4a   : > { %p592_p13 = scmp.lt.u32.totalorder %s851_s21, %s951_s0  ;;  %p593_p6 = scmp.lt.u32.totalorder %s591_s4, %s586_s22 }
  0x4b   : > { %p589_p2 = pnand %p588_p0, %p587_p12  ;;  %p595_p3 = scmp.lt.u32.totalorder %s586_s22, %s851_s21 }
  0x4c   : > { %p594_p10 = por %p593_p6, %p592_p13 }
  0x4d   : > { %p590_p1 = pneg %p589_p2 }
  0x4e   : > { %p596_p7 = por %p595_p3, %p594_p10 }
  0x50   : > { %p597_p9 = pnand %p596_p7, %p590_p1 }
  0x52   : > { %600 = shalt.err (!%p597_p9)
}
  0x53   : > { %s601_s9 = scalar_lea.vmem %s853_s26, 128  ;;  %s692_s10 = smov [#allocation2]  }
  0x54   : > { %p602_p12 = scmp.ne.s32.totalorder %s853_s26, %s601_s9  ;;  %s606_s25 = sshll.u32 %s692_s10, 4  ;;  %s607_s25 = int_to_ptr.vmem [resolvable:$false] %s606_s25 }
  0x55   : > { %s608_s11 = scalar_lea.vmem %s607_s25, 256  ;;  %p609_p4 = scmp.lt.s32.totalorder %s853_s26, %s607_s25 }
  0x56   : > { %p604_p2 = pnand %p602_p12, %p588_p0  ;;  %p610_p13 = scmp.lt.s32.totalorder %s608_s11, %s601_s9 }
  0x58   : > { %p605_p5 = pneg %p604_p2  ;;  %p611_p6 = por %p610_p13, %p609_p4 }
  0x5a   : > { %p612_p10 = pnand %p611_p6, %p605_p5 }
  0x5c   : > { %615 = shalt.err (!%p612_p10)
}
  0x5d   : > { %476 = dma.hbm_to_vmem [thread:$0]  (!%p855_p11), %s851_s21, 128, %s853_s26, %s157_s28  }
  0x5e   : > { %176 = sbr.rel (%p757_p8) target bundleno = 659 (0x293), region = 32  ;;  %s887_s17 = sand.u32 (!%p757_p8), 1, %s678_s13  }
  0x5f   : > { %s422_s24 = sshll.u32 (!%p757_p8), %s887_s17, 3  ;;  %s179_s22 = scalar_lea.sflag (!%p757_p8), [#allocation3], %s887_s17 }
  0x60   : > { %s182_s29 = scalar_lea.vmem (!%p757_p8), [#allocation2], %s422_s24  ;;  %p965_p4 = scmp.ne.s32.totalorder (!%p757_p8), %s958_s18, 0 }
  0x65   : > { %661 = dma.done.wait (%p965_p4), %s179_s22, 128  }
  0x66   : > { %663 = vsyncadd (%p965_p4), %s179_s22, 4294967168  ;;  %p966_p5 = scmp.eq.s32.totalorder %s738_s16, 0 }
  0x68   : > { %665 = dma.done.wait (%p966_p5), [#allocation6], 528   ;;  %p967_p8 = pmov %p966_p5 }
  0x69   : > { %v693_v0 = vmov 0.0|0.0   ;;  %vm694_vm0 = vmmov 0   ;;  %v695_v1 = vmov 0.0   ;;  %v214_v2 = vld [vmem:[#allocation5] sm:$0xff]  ;;  %v215_v3 = vld [vmem:[#allocation5 + $0x8] sm:$0xff]  ;;  %v216_v4 = vld [vmem:[#allocation5 + $0x10] sm:$0xff] }
  0x6a   : > { %667 = vsyncadd (%p967_p8), [#allocation6], 4294966768  ;;  %448 = vmatprep.subr.bf16.mxu0 %v693_v0  ;;  %445 = vmatprep.mubr.msk.f32.mxu0 %vm694_vm0, %v695_v1  ;;  %v449_v5 = vpack.c.bf16 %v215_v3, %v214_v2  ;;  %v217_v6 = vld [vmem:[#allocation5 + $0x18] sm:$0xff]  ;;  %vm225_vm1 = vcmask 261120   ;;  %v426_v9 = vld [vmem:[#allocation7] ss:$0 sm:$0xff] }
  0x6b   : > { %v452_v7 = vpack.c.bf16 %v217_v6, %v216_v4  ;;  %v213_v8 = vld [vmem:[%s182_s29] sm:$0xff]  ;;  %s429_s18 = sshll.u32 %s738_s16, 7  ;;  %s212_s20 = scalar_lea.vmem [#allocation8], %s422_s24 }
  0x6c   : > { %450 = vmatpush3.bf16.msra.mxu0 %v449_v5  ;;  %s325_s21 = sshll.u32 %s212_s20, 4  ;;  %s907_s28 = scalar_lea.hbm %s954_s3, %s429_s18  ;;  %s909_s21 = int_to_ptr.vmem [resolvable:$true] %s325_s21 }
  0x6d   : > { %451 = vmatprep.subr.bf16.mxu0 %v693_v0  ;;  %s312_s30 = scalar_lea.sflag [#allocation4], %s887_s17  ;;  %s616_s4 = scalar_lea.vmem %s909_s21, 128 }
  0x6e   : > { %p617_p11 = scmp.ne.s32.totalorder %s909_s21, %s616_s4  ;;  %p968_p0 = scmp.ne.s32.totalorder %s963_s7, 0 }
  0x6f   : > { %s696_s16 = smov [#allocation8]  }
  0x70   : > { %453 = vmatpush3.bf16.msra.mxu0 %v452_v7  ;;  %p618_p1 = pnand %p617_p11, %p968_p0  ;;  %s620_s23 = sshll.u32 %s696_s16, 4  ;;  %s621_s23 = int_to_ptr.vmem [resolvable:$false] %s620_s23 }
  0x71   : > { %s622_s6 = scalar_lea.vmem %s621_s23, 256  ;;  %p623_p7 = scmp.lt.s32.totalorder %s909_s21, %s621_s23 }
  0x72   : > { %p619_p3 = pneg %p618_p1  ;;  %p624_p9 = scmp.lt.s32.totalorder %s622_s6, %s616_s4 }
  0x73   : > { %446 = vmatmul.mubr.msk.f32.vlgmr.msra.gmra.mrb[0].mxu0 %vm225_vm1, %v213_v8 }
  0x74   : > { %p625_p12 = por %p624_p9, %p623_p7 }
  0x76   : > { %p626_p2 = pnand %p625_p12, %p619_p3 }
 0x146   : > { %v295_v10 = vpop.f32.mrb[0].mxu0 }
 0x147   : > { %v296_v11 = vadd.f32 %v426_v9, %v295_v10  ;;  %v447_v12 = vpop.f32.mrb[1].mxu0 }
 0x149   : > { %299 = vmax.xlane.f32.xlu0 %v296_v11 }
 0x1d6   : > { %v300_v13 = vpop.xlane.xlu0 %299 }
 0x1d7   : > { %v301_v14 = vsub.f32 %v296_v11, %v300_v13 }
 0x1d9   : > { %v302_v15 = vmul.f32 1.442695, %v301_v14 }
 0x1db   : > { %526 = vpow2.f32 %v302_v15 }
 0x1e5   : > { %v527_v16 = vpop.eup %526 }
 0x1e6   : > { %304 = vadd.xlane.f32.xlu0 %v527_v16 }
 0x273   : > { %v305_v17 = vpop.xlane.xlu0 %304 }
 0x274   : > { %528 = vlog2.f32 %v305_v17 }
 0x27e   : > { %v529_v18 = vpop.eup %528 }
 0x27f   : > { %v307_v19 = vmul.f32 0.6931472, %v529_v18 }
 0x281   : > { %v308_v20 = vadd.f32 %v307_v19, %v300_v13 }
 0x283   : > { %v309_v21 = vsub.f32 %v296_v11, %v308_v20 }
 0x285   : > { %310 = vst [vmem:[%s212_s20] sm:$0xff] %v309_v21 }
 0x286   : > { %629 = shalt.err (!%p626_p2)
}
 0x287   : > { %s630_s9 = scalar_lea.hbm %s907_s28, 128  ;;  %s634_s11 = scalar_lea.hbm %s954_s3, 256 }
 0x288   : > { %p631_p13 = scmp.ne.s32.totalorder %s907_s28, %s630_s9  ;;  %p635_p4 = scmp.lt.u32.totalorder %s907_s28, %s954_s3 }
 0x289   : > { %p636_p5 = scmp.lt.u32.totalorder %s634_s11, %s630_s9  ;;  %p638_p11 = scmp.lt.u32.totalorder %s630_s9, %s907_s28 }
 0x28a   : > { %p632_p6 = pnand %p631_p13, %p968_p0 }
 0x28b   : > { %p637_p8 = por %p636_p5, %p635_p4 }
 0x28c   : > { %p633_p10 = pneg %p632_p6 }
 0x28d   : > { %p639_p1 = por %p638_p11, %p637_p8 }
 0x28f   : > { %p640_p3 = pnand %p639_p1, %p633_p10 }
 0x291   : > { %643 = shalt.err (!%p640_p3)
}
 0x292   : > { %464 = dma.vmem_to_hbm [thread:$0]  (%p968_p0), %s909_s21, 128, %s907_s28, %s312_s30  }
 0x293 PF: > { %s337_s22 = sand.u32 1, %s674_s12   ;;  %p969_p7 = scmp.ne.s32.totalorder %s959_s19, 0 }
 0x294   : > { %p970_p9 = scmp.ge.s32.totalorder %s686_s15, 2  ;;  %s338_s29 = scalar_lea.sflag [#allocation4], %s337_s22 }
 0x296   : > { %p478_p12 = pnand %p970_p9, %p969_p7 }
 0x298   : > { %669 = dma.done.wait (!%p478_p12), %s338_s29, 128  }
 0x299   : > { %671 = vsyncadd (!%p478_p12), %s338_s29, 4294967168  ;;  %p17_p2 = scmp.ge.s32.totalorder %s828_s5, 4   ;;  %s971_s12 = smov %s678_s13 }
 0x29a   : > { %s972_s13 = smov %s682_s14  ;;  %s973_s14 = smov %s844_s8 }
 0x29b   : > { %s974_s15 = smov %s828_s5  ;;  %19 = sbr.rel (!%p17_p2) target bundleno = 6 (0x6), region = 85 }
 0x2a2   :  { %343 = vsyncpa [#allocation3], 1 }
 0x2a3   :  { %345 = vsyncpa [#allocation3 + $0x1], 1 }
 0x2a4   :  { %346 = vsyncpa [#allocation6], 1 }
 0x2a5   :  { %347 = vsyncpa [#allocation4], 1 }
 0x2a6   :  { %349 = vsyncpa [#allocation4 + $0x1], 1 }

// kernel: tpu_custom_call.1
= control target key start
LH: loop header
LB: loop body
LE: loop exit
PB: predicated region body
PF: predicated region fallthrough
CT: control target
= control target key end

     0   :  { %8 = vsyncpa [#allocation3], 0  ;;  %s951_s0 = inlined_call_operand.hbm [shape: f32[16,32], index: 0, kind: input, shape index: {}]   ;;  %s952_s1 = inlined_call_operand.hbm [shape: f32[32,128], index: 1, kind: input, shape index: {}]   ;;  %s953_s2 = inlined_call_operand.hbm [shape: f32[1,128], index: 2, kind: input, shape index: {}]   ;;  %s954_s3 = inlined_call_operand.hbm [shape: f32[16,128], index: 3, kind: output, shape index: {}]  }
   0x1   :  { %10 = vsyncpa [#allocation3 + $0x1], 0 }
   0x2   :  { %11 = vsyncpa [#allocation6], 0 }
   0x3   :  { %12 = vsyncpa [#allocation4], 0 }
   0x4   :  { %14 = vsyncpa [#allocation4 + $0x1], 0  ;;  %s717_s12 = smov 0   ;;  %s719_s13 = smov 0  }
   0x5   :  { %s721_s14 = smov 0   ;;  %s723_s15 = smov 0  }
   0x6 LB: > { %s738_s16 = sadd.s32 4294967295, %s686_s15   ;;  %s414_s17 = sadd.s32 4294967294, %s686_s15   ;;  %s686_s15 = sphi %s723_s15, %s974_s15   ;;  %s682_s14 = sphi %s721_s14, %s973_s14   ;;  %s678_s13 = sphi %s719_s13, %s972_s13   ;;  %s674_s12 = sphi %s717_s12, %s971_s12  }
   0x7   : > { %p40_p0 = scmp.ne.s32.totalorder %s678_s13, %s674_s12  ;;  %p955_p1 = scmp.eq.s32.totalorder %s738_s16, 0 }
   0x8   : > { %p112_p3 = scmp.eq.s32.totalorder %s414_s17, 1  ;;  %p415_p5 = scmp.ge.s32.totalorder %s686_s15, 1 }
   0x9   : > { %p747_p4 = por %p955_p1, %p40_p0  ;;  %p119_p7 = scmp.lt.s32.totalorder %s686_s15, 3 }
   0xa   : > { %p752_p6 = por %p112_p3, %p40_p0  ;;  %s688_s21 = smov [#allocation5]  }
   0xb   : > { %s958_s18 = scalar_select %p747_p4, 1, 0 }
   0xc   : > { %s959_s19 = scalar_select %p752_p6, 1, 0 }
   0xd   : > { %p757_p8 = pnand %p415_p5, %p119_p7  ;;  %s131_s22 = sshll.u32 %s688_s21, 4  ;;  %s761_s22 = int_to_ptr.vmem [resolvable:$true] %s131_s22 }
   0xe   : > { %s689_s24 = smov [#allocation7]   ;;  %s530_s28 = scalar_lea.hbm %s952_s1, 512 }
   0xf   : > { %p466_p9 = pneg %p757_p8  ;;  %s145_s25 = sshll.u32 %s689_s24, 4  ;;  %s772_s25 = int_to_ptr.vmem [resolvable:$true] %s145_s25 }
  0x10   : > { %p531_p12 = scmp.ne.s32.totalorder %s952_s1, %s530_s28  ;;  %p537_p5 = scmp.lt.u32.totalorder %s530_s28, %s952_s1 }
  0x11   : > { %p768_p11 = pnand %p466_p9, %p955_p1 }
  0x13   : > { %p532_p13 = pneg %p768_p11 }
  0x15   : > { %p533_p0 = pnand %p532_p13, %p531_p12 }
  0x17   : > { %p534_p3 = pneg %p533_p0 }
  0x19   : > { %p539_p7 = pnand %p537_p5, %p534_p3 }
  0x1b   : > { %542 = shalt.err (!%p539_p7)
}
  0x1c   : > { %s543_s6 = scalar_lea.vmem %s761_s22, 512  ;;  %p551_p2 = scmp.lt.s32.totalorder %s761_s22, %s761_s22 }
  0x1d   : > { %p544_p9 = scmp.ne.s32.totalorder %s761_s22, %s543_s6  ;;  %p552_p12 = scmp.lt.s32.totalorder %s543_s6, %s543_s6 }
  0x1f   : > { %p546_p10 = pnand %p544_p9, %p532_p13  ;;  %p553_p0 = por %p552_p12, %p551_p2 }
  0x21   : > { %p547_p1 = pneg %p546_p10 }
  0x23   : > { %p554_p6 = pnand %p553_p0, %p547_p1 }
  0x25   : > { %557 = shalt.err (!%p554_p6)
}
  0x26   : > { %s690_s7 = smov 128   ;;  %s691_s8 = smov 8  }
  0x27   : > { %469 = dma.hbm_to_vmem [thread:$0]  (!%p768_p11), %s952_s1, 512, %s761_s22, [#allocation6], %s690_s7, %s690_s7, %s691_s8  }
  0x28   : > { %s558_s21 = scalar_lea.hbm %s953_s2, 16 }
  0x29   : > { %p559_p2 = scmp.ne.s32.totalorder %s953_s2, %s558_s21  ;;  %p565_p10 = scmp.lt.u32.totalorder %s558_s21, %s953_s2 }
  0x2b   : > { %p561_p1 = pnand %p559_p2, %p532_p13 }
  0x2d   : > { %p562_p6 = pneg %p561_p1 }
  0x2f   : > { %p567_p3 = pnand %p565_p10, %p562_p6 }
  0x31   : > { %570 = shalt.err (!%p567_p3)
}
  0x32   : > { %s571_s22 = scalar_lea.vmem %s772_s25, 16  ;;  %s578_s29 = scalar_lea.vmem %s772_s25, 32 }
  0x33   : > { %p572_p5 = scmp.ne.s32.totalorder %s772_s25, %s571_s22  ;;  %p579_p12 = scmp.lt.s32.totalorder %s772_s25, %s772_s25 }
  0x34   : > { %p580_p0 = scmp.lt.s32.totalorder %s578_s29, %s571_s22 }
  0x35   : > { %p574_p7 = pnand %p572_p5, %p532_p13 }
  0x36   : > { %p581_p2 = por %p580_p0, %p579_p12 }
  0x37   : > { %p575_p9 = pneg %p574_p7 }
  0x39   : > { %p582_p1 = pnand %p581_p2, %p575_p9 }
  0x3b   : > { %585 = shalt.err (!%p582_p1)
}
  0x3c   : > { %472 = dma.hbm_to_vmem [thread:$0]  (!%p768_p11), %s953_s2, 16, %s772_s25, [#allocation6]  }
  0x3d   : > { %s828_s5 = sadd.s32 1, %s686_s15   ;;  %s27_s23 = sadd.s32 1, %s682_s14 }
  0x3e   : > { %s24_s6 = ssub.s32 %s686_s15, %s828_s5  ;;  %p34_p13 = scmp.ne.s32.totalorder %s682_s14, %s678_s13 }
  0x3f   : > { %p25_p6 = scmp.eq.s32.totalorder %s24_s6, 0  ;;  %p35_p10 = scmp.eq.s32.totalorder %s686_s15, 0 }
  0x40   : > { %p962_p3 = scmp.eq.s32.totalorder %s738_s16, 1  ;;  %p483_p7 = scmp.lt.s32.totalorder %s686_s15, 2 }
  0x41   : > { %s844_s8 = scalar_select %p25_p6, %s682_s14, %s27_s23  }
  0x42   : > { %p838_p5 = por %p962_p3, %p34_p13  ;;  %p36_p9 = por %p35_p10, %p34_p13 }
  0x43   : > { %s156_s9 = sand.u32 1, %s682_s14   ;;  %s420_s25 = sshll.u32 %s686_s15, 7 }
  0x44   : > { %s963_s7 = scalar_select %p838_p5, 1, 0 }
  0x45   : > { %s419_s10 = sshll.u32 %s156_s9, 3  ;;  %s851_s21 = scalar_lea.hbm %s951_s0, %s420_s25 }
  0x46   : > { %s160_s24 = scalar_lea.vmem [#allocation2], %s419_s10  ;;  %p855_p11 = pnand %p483_p7, %p36_p9 }
  0x47   : > { %s167_s26 = sshll.u32 %s160_s24, 4  ;;  %s157_s28 = scalar_lea.sflag [#allocation3], %s156_s9  ;;  %s853_s26 = int_to_ptr.vmem [resolvable:$true] %s167_s26 }
  0x48   : > { %s586_s22 = scalar_lea.hbm %s851_s21, 128  ;;  %p588_p0 = pneg %p855_p11 }
  0x49   : > { %p587_p12 = scmp.ne.s32.totalorder %s851_s21, %s586_s22  ;;  %s591_s4 = scalar_lea.hbm %s951_s0, 256 }
  0x4a   : > { %p592_p13 = scmp.lt.u32.totalorder %s851_s21, %s951_s0  ;;  %p593_p6 = scmp.lt.u32.totalorder %s591_s4, %s586_s22 }
  0x4b   : > { %p589_p2 = pnand %p588_p0, %p587_p12  ;;  %p595_p3 = scmp.lt.u32.totalorder %s586_s22, %s851_s21 }
  0x4c   : > { %p594_p10 = por %p593_p6, %p592_p13 }
  0x4d   : > { %p590_p1 = pneg %p589_p2 }
  0x4e   : > { %p596_p7 = por %p595_p3, %p594_p10 }
  0x50   : > { %p597_p9 = pnand %p596_p7, %p590_p1 }
  0x52   : > { %600 = shalt.err (!%p597_p9)
}
  0x53   : > { %s601_s9 = scalar_lea.vmem %s853_s26, 128  ;;  %s692_s10 = smov [#allocation2]  }
  0x54   : > { %p602_p12 = scmp.ne.s32.totalorder %s853_s26, %s601_s9  ;;  %s606_s25 = sshll.u32 %s692_s10, 4  ;;  %s607_s25 = int_to_ptr.vmem [resolvable:$false] %s606_s25 }
  0x55   : > { %s608_s11 = scalar_lea.vmem %s607_s25, 256  ;;  %p609_p4 = scmp.lt.s32.totalorder %s853_s26, %s607_s25 }
  0x56   : > { %p604_p2 = pnand %p602_p12, %p588_p0  ;;  %p610_p13 = scmp.lt.s32.totalorder %s608_s11, %s601_s9 }
  0x58   : > { %p605_p5 = pneg %p604_p2  ;;  %p611_p6 = por %p610_p13, %p609_p4 }
  0x5a   : > { %p612_p10 = pnand %p611_p6, %p605_p5 }
  0x5c   : > { %615 = shalt.err (!%p612_p10)
}
  0x5d   : > { %476 = dma.hbm_to_vmem [thread:$0]  (!%p855_p11), %s851_s21, 128, %s853_s26, %s157_s28  }
  0x5e   : > { %176 = sbr.rel (%p757_p8) target bundleno = 659 (0x293), region = 32  ;;  %s887_s17 = sand.u32 (!%p757_p8), 1, %s678_s13  }
  0x5f   : > { %s422_s24 = sshll.u32 (!%p757_p8), %s887_s17, 3  ;;  %s179_s22 = scalar_lea.sflag (!%p757_p8), [#allocation3], %s887_s17 }
  0x60   : > { %s182_s29 = scalar_lea.vmem (!%p757_p8), [#allocation2], %s422_s24  ;;  %p965_p4 = scmp.ne.s32.totalorder (!%p757_p8), %s958_s18, 0 }
  0x65   : > { %661 = dma.done.wait (%p965_p4), %s179_s22, 128  }
  0x66   : > { %663 = vsyncadd (%p965_p4), %s179_s22, 4294967168  ;;  %p966_p5 = scmp.eq.s32.totalorder %s738_s16, 0 }
  0x68   : > { %665 = dma.done.wait (%p966_p5), [#allocation6], 528   ;;  %p967_p8 = pmov %p966_p5 }
  0x69   : > { %v693_v0 = vmov 0.0|0.0   ;;  %vm694_vm0 = vmmov 0   ;;  %v695_v1 = vmov 0.0   ;;  %v214_v2 = vld [vmem:[#allocation5] sm:$0xff]  ;;  %v215_v3 = vld [vmem:[#allocation5 + $0x8] sm:$0xff]  ;;  %v216_v4 = vld [vmem:[#allocation5 + $0x10] sm:$0xff] }
  0x6a   : > { %667 = vsyncadd (%p967_p8), [#allocation6], 4294966768  ;;  %448 = vmatprep.subr.bf16.mxu0 %v693_v0  ;;  %445 = vmatprep.mubr.msk.f32.mxu0 %vm694_vm0, %v695_v1  ;;  %v449_v5 = vpack.c.bf16 %v215_v3, %v214_v2  ;;  %v217_v6 = vld [vmem:[#allocation5 + $0x18] sm:$0xff]  ;;  %vm225_vm1 = vcmask 261120   ;;  %v426_v9 = vld [vmem:[#allocation7] ss:$0 sm:$0xff] }
  0x6b   : > { %v452_v7 = vpack.c.bf16 %v217_v6, %v216_v4  ;;  %v213_v8 = vld [vmem:[%s182_s29] sm:$0xff]  ;;  %s429_s18 = sshll.u32 %s738_s16, 7  ;;  %s212_s20 = scalar_lea.vmem [#allocation8], %s422_s24 }
  0x6c   : > { %450 = vmatpush3.bf16.msra.mxu0 %v449_v5  ;;  %s325_s21 = sshll.u32 %s212_s20, 4  ;;  %s907_s28 = scalar_lea.hbm %s954_s3, %s429_s18  ;;  %s909_s21 = int_to_ptr.vmem [resolvable:$true] %s325_s21 }
  0x6d   : > { %451 = vmatprep.subr.bf16.mxu0 %v693_v0  ;;  %s312_s30 = scalar_lea.sflag [#allocation4], %s887_s17  ;;  %s616_s4 = scalar_lea.vmem %s909_s21, 128 }
  0x6e   : > { %p617_p11 = scmp.ne.s32.totalorder %s909_s21, %s616_s4  ;;  %p968_p0 = scmp.ne.s32.totalorder %s963_s7, 0 }
  0x6f   : > { %s696_s16 = smov [#allocation8]  }
  0x70   : > { %453 = vmatpush3.bf16.msra.mxu0 %v452_v7  ;;  %p618_p1 = pnand %p617_p11, %p968_p0  ;;  %s620_s23 = sshll.u32 %s696_s16, 4  ;;  %s621_s23 = int_to_ptr.vmem [resolvable:$false] %s620_s23 }
  0x71   : > { %s622_s6 = scalar_lea.vmem %s621_s23, 256  ;;  %p623_p7 = scmp.lt.s32.totalorder %s909_s21, %s621_s23 }
  0x72   : > { %p619_p3 = pneg %p618_p1  ;;  %p624_p9 = scmp.lt.s32.totalorder %s622_s6, %s616_s4 }
  0x73   : > { %446 = vmatmul.mubr.msk.f32.vlgmr.msra.gmra.mrb[0].mxu0 %vm225_vm1, %v213_v8 }
  0x74   : > { %p625_p12 = por %p624_p9, %p623_p7 }
  0x76   : > { %p626_p2 = pnand %p625_p12, %p619_p3 }
 0x146   : > { %v295_v10 = vpop.f32.mrb[0].mxu0 }
 0x147   : > { %v296_v11 = vadd.f32 %v426_v9, %v295_v10  ;;  %v447_v12 = vpop.f32.mrb[1].mxu0 }
 0x149   : > { %299 = vmax.xlane.f32.xlu0 %v296_v11 }
 0x1d6   : > { %v300_v13 = vpop.xlane.xlu0 %299 }
 0x1d7   : > { %v301_v14 = vsub.f32 %v296_v11, %v300_v13 }
 0x1d9   : > { %v302_v15 = vmul.f32 1.442695, %v301_v14 }
 0x1db   : > { %526 = vpow2.f32 %v302_v15 }
 0x1e5   : > { %v527_v16 = vpop.eup %526 }
 0x1e6   : > { %304 = vadd.xlane.f32.xlu0 %v527_v16 }
 0x273   : > { %v305_v17 = vpop.xlane.xlu0 %304 }
 0x274   : > { %528 = vlog2.f32 %v305_v17 }
 0x27e   : > { %v529_v18 = vpop.eup %528 }
 0x27f   : > { %v307_v19 = vmul.f32 0.6931472, %v529_v18 }
 0x281   : > { %v308_v20 = vadd.f32 %v307_v19, %v300_v13 }
 0x283   : > { %v309_v21 = vsub.f32 %v296_v11, %v308_v20 }
 0x285   : > { %310 = vst [vmem:[%s212_s20] sm:$0xff] %v309_v21 }
 0x286   : > { %629 = shalt.err (!%p626_p2)
}
 0x287   : > { %s630_s9 = scalar_lea.hbm %s907_s28, 128  ;;  %s634_s11 = scalar_lea.hbm %s954_s3, 256 }
 0x288   : > { %p631_p13 = scmp.ne.s32.totalorder %s907_s28, %s630_s9  ;;  %p635_p4 = scmp.lt.u32.totalorder %s907_s28, %s954_s3 }
 0x289   : > { %p636_p5 = scmp.lt.u32.totalorder %s634_s11, %s630_s9  ;;  %p638_p11 = scmp.lt.u32.totalorder %s630_s9, %s907_s28 }
 0x28a   : > { %p632_p6 = pnand %p631_p13, %p968_p0 }
 0x28b   : > { %p637_p8 = por %p636_p5, %p635_p4 }
 0x28c   : > { %p633_p10 = pneg %p632_p6 }
 0x28d   : > { %p639_p1 = por %p638_p11, %p637_p8 }
 0x28f   : > { %p640_p3 = pnand %p639_p1, %p633_p10 }
 0x291   : > { %643 = shalt.err (!%p640_p3)
}
 0x292   : > { %464 = dma.vmem_to_hbm [thread:$0]  (%p968_p0), %s909_s21, 128, %s907_s28, %s312_s30  }
 0x293 PF: > { %s337_s22 = sand.u32 1, %s674_s12   ;;  %p969_p7 = scmp.ne.s32.totalorder %s959_s19, 0 }
 0x294   : > { %p970_p9 = scmp.ge.s32.totalorder %s686_s15, 2  ;;  %s338_s29 = scalar_lea.sflag [#allocation4], %s337_s22 }
 0x296   : > { %p478_p12 = pnand %p970_p9, %p969_p7 }
 0x298   : > { %669 = dma.done.wait (!%p478_p12), %s338_s29, 128  }
 0x299   : > { %671 = vsyncadd (!%p478_p12), %s338_s29, 4294967168  ;;  %p17_p2 = scmp.ge.s32.totalorder %s828_s5, 4   ;;  %s971_s12 = smov %s678_s13 }
 0x29a   : > { %s972_s13 = smov %s682_s14  ;;  %s973_s14 = smov %s844_s8 }
 0x29b   : > { %s974_s15 = smov %s828_s5  ;;  %19 = sbr.rel (!%p17_p2) target bundleno = 6 (0x6), region = 85 }
 0x2a2   :  { %343 = vsyncpa [#allocation3], 1 }
 0x2a3   :  { %345 = vsyncpa [#allocation3 + $0x1], 1 }
 0x2a4   :  { %346 = vsyncpa [#allocation6], 1 }
 0x2a5   :  { %347 = vsyncpa [#allocation4], 1 }
 0x2a6   :  { %349 = vsyncpa [#allocation4 + $0x1], 1 }

</bundles_post_ra>
